<compile_context>
chip_gen: v5e
topology: v5e:2x2
jax: 0.10.0
libtpu: 0.0.40
codegen_flags: <defaults>
</compile_context>

<pallas_src>
import jax
import jax.numpy as jnp
from jax.experimental import pallas as pl
from jax.experimental.pallas import tpu as pltpu


STATE_DIM = 4
ACTION_DIM = 2
IN_DIM = STATE_DIM + ACTION_DIM       # 6
IN_PAD = 8                            # zero-padded layer-1 contraction dim
HIDDEN = 256
OUT_PAD = 128                         # lane-dense output: col 0 = q1, col 1 = q2


def _round_up(x, m):
    return ((x + m - 1) // m) * m


def _choose_tile(B, max_block_rows):
    """Adaptive batch tile: minimal padding, >=2 tiles for medium/large B."""
    if B <= 128:
        # Small / latency regime: one sublane-aligned tile.
        return _round_up(B, 16), 1
    # >= 2 tiles so v7x's second TensorCore gets work via the parallel axis,
    # while keeping padding to at most one tile's worth of rows.
    n_tiles = max(2, pl.cdiv(B, max_block_rows))
    TB = _round_up(pl.cdiv(B, n_tiles), 16)
    n_tiles = pl.cdiv(B, TB)
    return TB, n_tiles


def _critic_kernel(sa_ref,
                   w1_ref, b14_ref,
                   w2_ref, b2_ref,
                   w5_ref, b5_ref,
                   w3_ref, w6_ref, b36_ref,
                   q_ref):
    sa = sa_ref[...]                                    # bf16 [TB, 8]

    # Fused layer 1 (both branches): single dot -> [TB, 2*HIDDEN], f32 acc.
    h = jnp.dot(sa, w1_ref[...], preferred_element_type=jnp.float32) + b14_ref[...]
    h = jnp.maximum(h, 0.0).astype(jnp.bfloat16)
    h1 = h[:, :HIDDEN]           # Q1 branch activations
    h2 = h[:, HIDDEN:]           # Q2 branch activations

    # Layer 2 per branch: the dominant 256x256 MXU work.
    g1 = jnp.dot(h1, w2_ref[...], preferred_element_type=jnp.float32) + b2_ref[...]
    g2 = jnp.dot(h2, w5_ref[...], preferred_element_type=jnp.float32) + b5_ref[...]
    g1 = jnp.maximum(g1, 0.0).astype(jnp.bfloat16)
    g2 = jnp.maximum(g2, 0.0).astype(jnp.bfloat16)

    # Layer 3: split per-branch dots (no concat / no block-diagonal zeros),
    # lane-dense [TB, 128] result (q1 in col 0, q2 in col 1).
    q = (jnp.dot(g1, w3_ref[...], preferred_element_type=jnp.float32)
         + jnp.dot(g2, w6_ref[...], preferred_element_type=jnp.float32)
         + b36_ref[...])
    q_ref[...] = q.astype(q_ref.dtype)


def prepare_params(params):
    """One-time repack of f32 [in, out]-layout params into the fused kernel layout."""
    bf16, f32 = jnp.bfloat16, jnp.float32

    # Layer-1 fusion of both branches, K padded 6 -> 8 with zero rows.
    w14 = jnp.concatenate([params["w1"], params["w4"]], axis=1)        # [6, 512]
    w14 = jnp.pad(w14, ((0, IN_PAD - IN_DIM), (0, 0)))                 # [8, 512]
    b14 = jnp.concatenate([params["b1"], params["b4"]], axis=1)        # [1, 512]

    # Layer-3 per-branch weights, columns padded 1 -> 128 (lane-dense output).
    w3p = jnp.pad(params["w3"], ((0, 0), (0, OUT_PAD - 1)))            # [256, 128] (col 0)
    w6p = jnp.pad(params["w6"], ((0, 0), (1, OUT_PAD - 2)))            # [256, 128] (col 1)
    b36 = (jnp.pad(params["b3"], ((0, 0), (0, OUT_PAD - 1)))
           + jnp.pad(params["b6"], ((0, 0), (1, OUT_PAD - 2))))        # [1, 128]

    return {
        "w1": w14.astype(bf16),            # [8, 512]
        "b14": b14.astype(f32),            # [1, 512]
        "w2": params["w2"].astype(bf16),   # [256, 256]
        "b2": params["b2"].astype(f32),    # [1, 256]
        "w5": params["w5"].astype(bf16),   # [256, 256]
        "b5": params["b5"].astype(f32),    # [1, 256]
        "w3": w3p.astype(bf16),            # [256, 128]
        "w6": w6p.astype(bf16),            # [256, 128]
        "b36": b36.astype(f32),            # [1, 128]
    }


def critic_forward(state, action, prepared, *, max_block_rows=1024):
    """Pallas equivalent of Critic.forward(state, action) -> (q1, q2)."""
    B = state.shape[0]
    TB, n_tiles = _choose_tile(B, max_block_rows)
    B_pad = TB * n_tiles

    # Single pre-packed bf16 [B_pad, 8] state||action input (concat of two tiny
    # arrays is a trivial fused XLA op; halves input DMA vs two f32 streams).
    sa = jnp.concatenate(
        [state.astype(jnp.float32), action.astype(jnp.float32)], axis=1)
    sa = jnp.pad(sa, ((0, B_pad - B), (0, IN_PAD - IN_DIM))).astype(jnp.bfloat16)

    p = prepared

    def batch_map(i):
        return (i, 0)

    def const_map(i):
        return (0, 0)

    in_specs = [
        pl.BlockSpec((TB, IN_PAD), batch_map),
        pl.BlockSpec(p["w1"].shape, const_map),
        pl.BlockSpec(p["b14"].shape, const_map),
        pl.BlockSpec(p["w2"].shape, const_map),
        pl.BlockSpec(p["b2"].shape, const_map),
        pl.BlockSpec(p["w5"].shape, const_map),
        pl.BlockSpec(p["b5"].shape, const_map),
        pl.BlockSpec(p["w3"].shape, const_map),
        pl.BlockSpec(p["w6"].shape, const_map),
        pl.BlockSpec(p["b36"].shape, const_map),
    ]
    out_specs = pl.BlockSpec((TB, OUT_PAD), batch_map)

    q = pl.pallas_call(
        _critic_kernel,
        grid=(n_tiles,),
        in_specs=in_specs,
        out_specs=out_specs,
        out_shape=jax.ShapeDtypeStruct((B_pad, OUT_PAD), jnp.float32),
        compiler_params=pltpu.CompilerParams(
            dimension_semantics=("parallel",)),
    )(sa,
      p["w1"], p["b14"],
      p["w2"], p["b2"],
      p["w5"], p["b5"],
      p["w3"], p["w6"], p["b36"])

    q1 = q[:B, 0:1]
    q2 = q[:B, 1:2]
    return q1, q2


def init_critic_params(key, state_dim=STATE_DIM, action_dim=ACTION_DIM, hidden=HIDDEN):
    """Deterministic init mimicking nn.Linear default (U(-1/sqrt(fan_in), ...)).

    Weights are stored as [in, out] (transpose of PyTorch's [out, in])."""
    in_dim = state_dim + action_dim
    dims = [(in_dim, hidden), (hidden, hidden), (hidden, 1),
            (in_dim, hidden), (hidden, hidden), (hidden, 1)]
    params = {}
    keys = jax.random.split(key, 2 * len(dims))
    for i, (fi, fo) in enumerate(dims):
        bound = 1.0 / jnp.sqrt(fi)
        w = jax.random.uniform(keys[2 * i], (fi, fo), jnp.float32, -bound, bound)
        b = jax.random.uniform(keys[2 * i + 1], (1, fo), jnp.float32, -bound, bound)
        params[f"w{i + 1}"] = w
        params[f"b{i + 1}"] = b
    return params


def critic_ref(state, action, params):
    """Pure-JAX f32 reference matching the original torch module."""
    sa = jnp.concatenate([state, action], axis=1)
    h1 = jax.nn.relu(sa @ params["w1"] + params["b1"])
    h1 = jax.nn.relu(h1 @ params["w2"] + params["b2"])
    q1 = h1 @ params["w3"] + params["b3"]
    h2 = jax.nn.relu(sa @ params["w4"] + params["b4"])
    h2 = jax.nn.relu(h2 @ params["w5"] + params["b5"])
    q2 = h2 @ params["w6"] + params["b6"]
    return q1, q2


if __name__ == "__main__":
    key = jax.random.PRNGKey(0)
    k_params, k_state, k_action = jax.random.split(key, 3)

    params = init_critic_params(k_params)
    prepared = prepare_params(params)

    ok = True
    # B=8: small / latency regime (single tile).  B=300: multi-tile path with
    # adaptive padding (>=2 parallel grid steps for v7x).
    for B in (8, 300):
        ks, ka = jax.random.split(jax.random.fold_in(k_state, B))
        state = jax.random.normal(ks, (B, STATE_DIM), jnp.float32)
        action = jax.random.uniform(ka, (B, ACTION_DIM), jnp.float32, -1.0, 1.0)

        q1, q2 = critic_forward(state, action, prepared)
        jax.block_until_ready((q1, q2))

        q1_ref, q2_ref = critic_ref(state, action, params)
        ok &= (q1.shape == (B, 1)) and (q2.shape == (B, 1))
        # bf16 matmul inputs (f32 accumulation) -> bf16-appropriate tolerance.
        ok &= bool(jnp.allclose(q1, q1_ref, atol=5e-2, rtol=5e-2))
        ok &= bool(jnp.allclose(q2, q2_ref, atol=5e-2, rtol=5e-2))

    assert ok
    print("KERNEL_OK")
</pallas_src>

<mosaic_0001>
module attributes {stable_mosaic.version = 11 : i64} {
  func.func @_critic_kernel(%arg0: i32, %arg1: memref<16x8xbf16, #tpu.memory_space<vmem>>, %arg2: memref<8x512xbf16, #tpu.memory_space<vmem>>, %arg3: memref<1x512xf32, #tpu.memory_space<vmem>>, %arg4: memref<256x256xbf16, #tpu.memory_space<vmem>>, %arg5: memref<1x256xf32, #tpu.memory_space<vmem>>, %arg6: memref<256x256xbf16, #tpu.memory_space<vmem>>, %arg7: memref<1x256xf32, #tpu.memory_space<vmem>>, %arg8: memref<256x128xbf16, #tpu.memory_space<vmem>>, %arg9: memref<256x128xbf16, #tpu.memory_space<vmem>>, %arg10: memref<1x128xf32, #tpu.memory_space<vmem>>, %arg11: memref<16x128xf32, #tpu.memory_space<vmem>>) attributes {dimension_semantics = [#tpu.dimension_semantics<parallel>], iteration_bounds = array<i64: 1>, scalar_prefetch = 0 : i64, scratch_operands = 0 : i64, tpu.core_type = #tpu.core_type<tc>, window_params = [{transform_indices = @transform_0, window_bounds = array<i64: 16, 8>}, {pipeline_mode = #tpu.pipeline_mode<synchronous>, transform_indices = @transform_1, window_bounds = array<i64: 8, 512>}, {pipeline_mode = #tpu.pipeline_mode<synchronous>, transform_indices = @transform_2, window_bounds = array<i64: 1, 512>}, {pipeline_mode = #tpu.pipeline_mode<synchronous>, transform_indices = @transform_3, window_bounds = array<i64: 256, 256>}, {pipeline_mode = #tpu.pipeline_mode<synchronous>, transform_indices = @transform_4, window_bounds = array<i64: 1, 256>}, {pipeline_mode = #tpu.pipeline_mode<synchronous>, transform_indices = @transform_5, window_bounds = array<i64: 256, 256>}, {pipeline_mode = #tpu.pipeline_mode<synchronous>, transform_indices = @transform_6, window_bounds = array<i64: 1, 256>}, {pipeline_mode = #tpu.pipeline_mode<synchronous>, transform_indices = @transform_7, window_bounds = array<i64: 256, 128>}, {pipeline_mode = #tpu.pipeline_mode<synchronous>, transform_indices = @transform_8, window_bounds = array<i64: 256, 128>}, {pipeline_mode = #tpu.pipeline_mode<synchronous>, transform_indices = @transform_9, window_bounds = array<i64: 1, 128>}, {transform_indices = @transform_10, window_bounds = array<i64: 16, 128>}]} {
    %c0 = arith.constant 0 : index
    %c0_0 = arith.constant 0 : index
    %0 = vector.load %arg1[%c0, %c0_0] : memref<16x8xbf16, #tpu.memory_space<vmem>>, vector<16x8xbf16>
    %c0_1 = arith.constant 0 : index
    %c0_2 = arith.constant 0 : index
    %1 = vector.load %arg2[%c0_1, %c0_2] : memref<8x512xbf16, #tpu.memory_space<vmem>>, vector<8x512xbf16>
    %cst = arith.constant dense<0.000000e+00> : vector<16x512xf32>
    %2 = tpu.matmul %0, %1, %cst {dimension_numbers = #tpu.dot_dimension_numbers<[1], [0], [0], [1], [0, 0, 1, 1], [], []>} : vector<16x8xbf16>, vector<8x512xbf16>, vector<16x512xf32> -> vector<16x512xf32>
    %c0_3 = arith.constant 0 : index
    %c0_4 = arith.constant 0 : index
    %3 = vector.load %arg3[%c0_3, %c0_4] : memref<1x512xf32, #tpu.memory_space<vmem>>, vector<1x512xf32>
    %4 = vector.broadcast %3 : vector<1x512xf32> to vector<16x512xf32>
    %5 = arith.addf %2, %4 : vector<16x512xf32>
    %cst_5 = arith.constant 0.000000e+00 : f32
    %6 = vector.broadcast %cst_5 : f32 to vector<16x512xf32>
    %7 = arith.maximumf %5, %6 : vector<16x512xf32>
    %8 = arith.truncf %7 : vector<16x512xf32> to vector<16x512xbf16>
    %9 = vector.extract_strided_slice %8 {offsets = [0, 0], sizes = [16, 256], strides = [1, 1]} : vector<16x512xbf16> to vector<16x256xbf16>
    %10 = vector.extract_strided_slice %8 {offsets = [0, 256], sizes = [16, 256], strides = [1, 1]} : vector<16x512xbf16> to vector<16x256xbf16>
    %c0_6 = arith.constant 0 : index
    %c0_7 = arith.constant 0 : index
    %11 = vector.load %arg4[%c0_6, %c0_7] : memref<256x256xbf16, #tpu.memory_space<vmem>>, vector<256x256xbf16>
    %cst_8 = arith.constant dense<0.000000e+00> : vector<16x256xf32>
    %12 = tpu.matmul %9, %11, %cst_8 {dimension_numbers = #tpu.dot_dimension_numbers<[1], [0], [0], [1], [0, 0, 1, 1], [], []>} : vector<16x256xbf16>, vector<256x256xbf16>, vector<16x256xf32> -> vector<16x256xf32>
    %c0_9 = arith.constant 0 : index
    %c0_10 = arith.constant 0 : index
    %13 = vector.load %arg5[%c0_9, %c0_10] : memref<1x256xf32, #tpu.memory_space<vmem>>, vector<1x256xf32>
    %14 = vector.broadcast %13 : vector<1x256xf32> to vector<16x256xf32>
    %15 = arith.addf %12, %14 : vector<16x256xf32>
    %c0_11 = arith.constant 0 : index
    %c0_12 = arith.constant 0 : index
    %16 = vector.load %arg6[%c0_11, %c0_12] : memref<256x256xbf16, #tpu.memory_space<vmem>>, vector<256x256xbf16>
    %cst_13 = arith.constant dense<0.000000e+00> : vector<16x256xf32>
    %17 = tpu.matmul %10, %16, %cst_13 {dimension_numbers = #tpu.dot_dimension_numbers<[1], [0], [0], [1], [0, 0, 1, 1], [], []>} : vector<16x256xbf16>, vector<256x256xbf16>, vector<16x256xf32> -> vector<16x256xf32>
    %c0_14 = arith.constant 0 : index
    %c0_15 = arith.constant 0 : index
    %18 = vector.load %arg7[%c0_14, %c0_15] : memref<1x256xf32, #tpu.memory_space<vmem>>, vector<1x256xf32>
    %19 = vector.broadcast %18 : vector<1x256xf32> to vector<16x256xf32>
    %20 = arith.addf %17, %19 : vector<16x256xf32>
    %cst_16 = arith.constant 0.000000e+00 : f32
    %21 = vector.broadcast %cst_16 : f32 to vector<16x256xf32>
    %22 = arith.maximumf %15, %21 : vector<16x256xf32>
    %23 = arith.truncf %22 : vector<16x256xf32> to vector<16x256xbf16>
    %cst_17 = arith.constant 0.000000e+00 : f32
    %24 = vector.broadcast %cst_17 : f32 to vector<16x256xf32>
    %25 = arith.maximumf %20, %24 : vector<16x256xf32>
    %26 = arith.truncf %25 : vector<16x256xf32> to vector<16x256xbf16>
    %c0_18 = arith.constant 0 : index
    %c0_19 = arith.constant 0 : index
    %27 = vector.load %arg8[%c0_18, %c0_19] : memref<256x128xbf16, #tpu.memory_space<vmem>>, vector<256x128xbf16>
    %cst_20 = arith.constant dense<0.000000e+00> : vector<16x128xf32>
    %28 = tpu.matmul %23, %27, %cst_20 {dimension_numbers = #tpu.dot_dimension_numbers<[1], [0], [0], [1], [0, 0, 1, 1], [], []>} : vector<16x256xbf16>, vector<256x128xbf16>, vector<16x128xf32> -> vector<16x128xf32>
    %c0_21 = arith.constant 0 : index
    %c0_22 = arith.constant 0 : index
    %29 = vector.load %arg9[%c0_21, %c0_22] : memref<256x128xbf16, #tpu.memory_space<vmem>>, vector<256x128xbf16>
    %cst_23 = arith.constant dense<0.000000e+00> : vector<16x128xf32>
    %30 = tpu.matmul %26, %29, %cst_23 {dimension_numbers = #tpu.dot_dimension_numbers<[1], [0], [0], [1], [0, 0, 1, 1], [], []>} : vector<16x256xbf16>, vector<256x128xbf16>, vector<16x128xf32> -> vector<16x128xf32>
    %31 = arith.addf %28, %30 : vector<16x128xf32>
    %c0_24 = arith.constant 0 : index
    %c0_25 = arith.constant 0 : index
    %32 = vector.load %arg10[%c0_24, %c0_25] : memref<1x128xf32, #tpu.memory_space<vmem>>, vector<1x128xf32>
    %33 = vector.broadcast %32 : vector<1x128xf32> to vector<16x128xf32>
    %34 = arith.addf %31, %33 : vector<16x128xf32>
    %c0_26 = arith.constant 0 : index
    %c0_27 = arith.constant 0 : index
    %35 = vector.load %arg11[%c0_26, %c0_27] : memref<16x128xf32, #tpu.memory_space<vmem>>, vector<16x128xf32>
    tpu.vector_store %arg11[%c0_26, %c0_27], %34 {strides = array<i32>} : memref<16x128xf32, #tpu.memory_space<vmem>>, vector<16x128xf32>,
    return
  }
  func.func @transform_0(%arg0: i32) -> (i32, i32) {
    %c0_i32 = arith.constant 0 : i32
    %c0_i32_0 = arith.constant 0 : i32
    return %arg0, %c0_i32 : i32, i32
  }
  func.func @transform_1(%arg0: i32) -> (i32, i32) {
    %c0_i32 = arith.constant 0 : i32
    %c0_i32_0 = arith.constant 0 : i32
    %c0_i32_1 = arith.constant 0 : i32
    return %c0_i32, %c0_i32_0 : i32, i32
  }
  func.func @transform_2(%arg0: i32) -> (i32, i32) {
    %c0_i32 = arith.constant 0 : i32
    %c0_i32_0 = arith.constant 0 : i32
    %c0_i32_1 = arith.constant 0 : i32
    return %c0_i32, %c0_i32_0 : i32, i32
  }
  func.func @transform_3(%arg0: i32) -> (i32, i32) {
    %c0_i32 = arith.constant 0 : i32
    %c0_i32_0 = arith.constant 0 : i32
    %c0_i32_1 = arith.constant 0 : i32
    return %c0_i32, %c0_i32_0 : i32, i32
  }
  func.func @transform_4(%arg0: i32) -> (i32, i32) {
    %c0_i32 = arith.constant 0 : i32
    %c0_i32_0 = arith.constant 0 : i32
    %c0_i32_1 = arith.constant 0 : i32
    return %c0_i32, %c0_i32_0 : i32, i32
  }
  func.func @transform_5(%arg0: i32) -> (i32, i32) {
    %c0_i32 = arith.constant 0 : i32
    %c0_i32_0 = arith.constant 0 : i32
    %c0_i32_1 = arith.constant 0 : i32
    return %c0_i32, %c0_i32_0 : i32, i32
  }
  func.func @transform_6(%arg0: i32) -> (i32, i32) {
    %c0_i32 = arith.constant 0 : i32
    %c0_i32_0 = arith.constant 0 : i32
    %c0_i32_1 = arith.constant 0 : i32
    return %c0_i32, %c0_i32_0 : i32, i32
  }
  func.func @transform_7(%arg0: i32) -> (i32, i32) {
    %c0_i32 = arith.constant 0 : i32
    %c0_i32_0 = arith.constant 0 : i32
    %c0_i32_1 = arith.constant 0 : i32
    return %c0_i32, %c0_i32_0 : i32, i32
  }
  func.func @transform_8(%arg0: i32) -> (i32, i32) {
    %c0_i32 = arith.constant 0 : i32
    %c0_i32_0 = arith.constant 0 : i32
    %c0_i32_1 = arith.constant 0 : i32
    return %c0_i32, %c0_i32_0 : i32, i32
  }
  func.func @transform_9(%arg0: i32) -> (i32, i32) {
    %c0_i32 = arith.constant 0 : i32
    %c0_i32_0 = arith.constant 0 : i32
    %c0_i32_1 = arith.constant 0 : i32
    return %c0_i32, %c0_i32_0 : i32, i32
  }
  func.func @transform_10(%arg0: i32) -> (i32, i32) {
    %c0_i32 = arith.constant 0 : i32
    %c0_i32_0 = arith.constant 0 : i32
    return %arg0, %c0_i32 : i32, i32
  }
}

</mosaic_0001>

<bundles_post_ra>
// kernel: tpu_custom_call.1
= control target key start
LH: loop header
LB: loop body
LE: loop exit
PB: predicated region body
PF: predicated region fallthrough
CT: control target
= control target key end

     0   :  { %15 = vsyncpa [#allocation3], 0  ;;  %s1881_s0 = inlined_call_operand.vmem [shape: bf16[16,8], index: 0, kind: input, shape index: {}]   ;;  %s1882_s1 = inlined_call_operand.hbm [shape: bf16[8,512], index: 1, kind: input, shape index: {}]   ;;  %s1883_s2 = inlined_call_operand.vmem [shape: f32[1,512], index: 2, kind: input, shape index: {}]   ;;  %s1884_s3 = inlined_call_operand.hbm [shape: bf16[256,256], index: 3, kind: input, shape index: {}]   ;;  %s1885_s4 = inlined_call_operand.vmem [shape: f32[1,256], index: 4, kind: input, shape index: {}]   ;;  %s1886_s5 = inlined_call_operand.hbm [shape: bf16[256,256], index: 5, kind: input, shape index: {}]   ;;  %s1887_s6 = inlined_call_operand.vmem [shape: f32[1,256], index: 6, kind: input, shape index: {}]   ;;  %s1888_s7 = inlined_call_operand.hbm [shape: bf16[256,128], index: 7, kind: input, shape index: {}]   ;;  %s1889_s8 = inlined_call_operand.hbm [shape: bf16[256,128], index: 8, kind: input, shape index: {}]   ;;  %s1890_s9 = inlined_call_operand.vmem [shape: f32[1,128], index: 9, kind: input, shape index: {}]   ;;  %s1891_s10 = inlined_call_operand.hbm [shape: f32[16,128], index: 10, kind: output, shape index: {}]  }
   0x1   :  { %16 = vsyncpa [#allocation6], 0 }
   0x2   :  { %17 = vsyncpa [#allocation9], 0  ;;  %s38_s15 = sshll.u32 %s1884_s3, 4  ;;  %s39_s15 = int_to_ptr.hbm [resolvable:$true] %s38_s15 }
   0x3   :  { %18 = vsyncpa [#allocation4], 0  ;;  %s1760_s16 = smov [#allocation5]   ;;  %s68_s20 = sshll.u32 %s1888_s7, 4  ;;  %s69_s20 = int_to_ptr.hbm [resolvable:$true] %s68_s20 }
   0x4   :  { %s40_s17 = sshll.u32 %s1760_s16, 4  ;;  %s1761_s21 = smov 128   ;;  %s41_s17 = int_to_ptr.vmem [resolvable:$true] %s40_s17 }
   0x5   :  { %s1762_s22 = smov 8   ;;  %s1763_s23 = smov [#allocation8]  }
   0x6   :  { %46 = dma.hbm_to_vmem [thread:$0]  %s39_s15, 4096, %s41_s17, [#allocation6], %s1761_s21, %s1761_s21, %s1762_s22  }
   0x7   :  { %s70_s24 = sshll.u32 %s1763_s23, 4  ;;  %s1764_s3 = smov 64   ;;  %s71_s24 = int_to_ptr.vmem [resolvable:$true] %s70_s24 }
   0x8   :  { %s1765_s25 = smov 4   ;;  %s26_s28 = sshll.u32 %s1882_s1, 4  ;;  %s27_s28 = int_to_ptr.hbm [resolvable:$true] %s26_s28 }
   0x9   :  { %76 = dma.hbm_to_vmem [thread:$0]  %s69_s20, 2048, %s71_s24, [#allocation9], %s1764_s3, %s1764_s3, %s1765_s25  }
   0xa   :  { %s1766_s29 = smov [#allocation2]   ;;  %s53_s12 = sshll.u32 %s1886_s5, 4  ;;  %s54_s12 = int_to_ptr.hbm [resolvable:$true] %s53_s12 }
   0xb   :  { %s28_s7 = sshll.u32 %s1766_s29, 4  ;;  %s1767_s13 = smov [#allocation7]   ;;  %s29_s7 = int_to_ptr.vmem [resolvable:$true] %s28_s7 }
   0xc   :  { %31 = dma.hbm_to_vmem [thread:$0]  %s27_s28, 256, %s29_s7, [#allocation3]  }
   0xd   :  { %s55_s14 = sshll.u32 %s1767_s13, 4  ;;  %s81_s17 = sshll.u32 %s1889_s8, 4  ;;  %s56_s14 = int_to_ptr.vmem [resolvable:$true] %s55_s14  ;;  %s82_s17 = int_to_ptr.hbm [resolvable:$true] %s81_s17 }
   0xe   :  { %61 = dma.hbm_to_vmem [thread:$0]  %s54_s12, 4096, %s56_s14, [#allocation6], %s1761_s21, %s1761_s21, %s1762_s22  }
   0xf   :  { %s1768_s1 = smov [#allocation10]  }
  0x10   :  { %s83_s18 = sshll.u32 %s1768_s1, 4  ;;  %s84_s18 = int_to_ptr.vmem [resolvable:$true] %s83_s18 }
  0x11   :  { %89 = dma.hbm_to_vmem [thread:$0]  %s82_s17, 2048, %s84_s18, [#allocation9], %s1764_s3, %s1764_s3, %s1765_s25  }
  0x12   :  { %1752 = dma.done.wait [#allocation3], 256  }
  0x13   :  { %1753 = vsyncadd [#allocation3], 4294967040 }
  0x14   :  { %1754 = dma.done.wait [#allocation6], 8192  }
  0x15   :  { %1755 = vsyncadd [#allocation6], 4294959104 }
  0x16   :  { %1756 = dma.done.wait [#allocation9], 4096  }
  0x17   :  { %1757 = vsyncadd [#allocation9], 4294963200  ;;  %v115_v0 = vld [vmem:[#allocation2] sm:$0xff]  ;;  %v116_v1 = vld [vmem:[#allocation2 + $0x8] sm:$0xff]  ;;  %vm146_vm0 = vcmask 1043456   ;;  %vm142_vm1 = vcmask 64512  }
  0x18   :  { %v134_v2 = vunpack.c.l.b16 %v115_v0  ;;  %v135_v3 = vunpack.c.h.b16 %v115_v0  ;;  %v136_v4 = vunpack.c.l.b16 %v116_v1  ;;  %v137_v5 = vunpack.c.h.b16 %v116_v1  ;;  %v1174_v6 = vld [vmem:[#allocation5 + $0x70] sm:$0xf]  ;;  %v1516_v7 = vld [vmem:[#allocation5 + $0x74] sm:$0xf0]  ;;  %v1515_v10 = vld [vmem:[#allocation5 + $0x74] sm:$0xf] }
  0x19   :  { %v1238_v8 = vld [vmem:[#allocation5 + $0xf0] sm:$0xf]  ;;  %v1532_v9 = vld [vmem:[#allocation5 + $0xf4] sm:$0xf0]  ;;  %v1176_v16 = vld [vmem:[#allocation5 + $0x78] sm:$0xf0]  ;;  %v1175_v19 = vor.u32 %v1516_v7, %v1174_v6 }
  0x1a   :  { %v138_v11 = vpack.c.b16 %v134_v2, %v134_v2  ;;  %v139_v12 = vpack.c.b16 %v135_v3, %v135_v3  ;;  %v140_v13 = vpack.c.b16 %v136_v4, %v136_v4  ;;  %v141_v14 = vpack.c.b16 %v137_v5, %v137_v5  ;;  %v1500_v15 = vld [vmem:[%s1881_s0] sm:$0xff]  ;;  %v1240_v18 = vld [vmem:[#allocation5 + $0xf8] sm:$0xf0]  ;;  %v1166_v21 = vld [vmem:[#allocation5 + $0x60] sm:$0xf]  ;;  %s1769_s3 = smov [#allocation11]  }
  0x1b   :  { %v1531_v17 = vld [vmem:[#allocation5 + $0xf4] sm:$0xf]  ;;  %v1239_v20 = vor.u32 %v1532_v9, %v1238_v8  ;;  %v1514_v22 = vld [vmem:[#allocation5 + $0x64] sm:$0xf0]  ;;  %v1230_v23 = vld [vmem:[#allocation5 + $0xe0] sm:$0xf]  ;;  %v1179_v29 = vor.u32 %v1515_v10, %v1176_v16 }
  0x1c   :  { %v148_v24 = vsel %vm146_vm0, %v138_v11, 0  ;;  %v151_v25 = vsel %vm146_vm0, %v139_v12, 0  ;;  %v154_v26 = vsel %vm146_vm0, %v140_v13, 0  ;;  %v157_v27 = vsel %vm146_vm0, %v141_v14, 0  ;;  %v1530_v28 = vld [vmem:[#allocation5 + $0xe4] sm:$0xf0] }
  0x1d   :  { %166 = vmatpush.bf16.msra.mxu0 %v148_v24  ;;  %180 = vmatpush.bf16.msra.mxu1 %v151_v25  ;;  %v1243_v30 = vor.u32 %v1531_v17, %v1240_v18  ;;  %v1513_v31 = vld [vmem:[#allocation5 + $0x64] sm:$0xf]  ;;  %v1168_v32 = vld [vmem:[#allocation5 + $0x68] sm:$0xf0]  ;;  %v1167_v33 = vor.u32 %v1514_v22, %v1166_v21  ;;  %v1231_v34 = vor.u32 %v1530_v28, %v1230_v23  ;;  %v1158_v37 = vld [vmem:[#allocation5 + $0x50] sm:$0xf] }
  0x1e   :  { %194 = vmatpush.bf16.msra.mxu2 %v154_v26  ;;  %208 = vmatpush.bf16.msra.mxu3 %v157_v27  ;;  %v1529_v35 = vld [vmem:[#allocation5 + $0xe4] sm:$0xf]  ;;  %v1232_v36 = vld [vmem:[#allocation5 + $0xe8] sm:$0xf0]  ;;  %v1512_v38 = vld [vmem:[#allocation5 + $0x54] sm:$0xf0]  ;;  %v1171_v41 = vor.u32 %v1513_v31, %v1168_v32 }
  0x1f   :  { %v1222_v39 = vld [vmem:[#allocation5 + $0xd0] sm:$0xf]  ;;  %v1528_v40 = vld [vmem:[#allocation5 + $0xd4] sm:$0xf0]  ;;  %v1235_v42 = vor.u32 %v1529_v35, %v1232_v36  ;;  %v1511_v43 = vld [vmem:[#allocation5 + $0x54] sm:$0xf]  ;;  %v1159_v45 = vor.u32 %v1512_v38, %v1158_v37 }
  0x20   :  { %1112 = vmatmul.msk.bf16.vlgmr.msra.gmra.mxu0 %vm142_vm1, %v1500_v15  ;;  %1113 = vmatmul.msk.bf16.vlgmr.msra.gmra.mxu1 %vm142_vm1, %v1500_v15  ;;  %v1160_v44 = vld [vmem:[#allocation5 + $0x58] sm:$0xf0]  ;;  %v1223_v46 = vor.u32 %v1528_v40, %v1222_v39  ;;  %v1527_v47 = vld [vmem:[#allocation5 + $0xd4] sm:$0xf]  ;;  %v1150_v49 = vld [vmem:[#allocation5 + $0x40] sm:$0xf] }
  0x21   :  { %435 = vmatpush.bf16.msrb.mxu0 %v1175_v19  ;;  %449 = vmatpush.bf16.msrb.mxu1 %v1239_v20  ;;  %v1224_v48 = vld [vmem:[#allocation5 + $0xd8] sm:$0xf0]  ;;  %v1510_v50 = vld [vmem:[#allocation5 + $0x44] sm:$0xf0]  ;;  %v1214_v51 = vld [vmem:[#allocation5 + $0xc0] sm:$0xf]  ;;  %v1163_v53 = vor.u32 %v1511_v43, %v1160_v44 }
  0x22   :  { %1114 = vmatmul.msk.bf16.vlgmr.msra.gmra.mxu2 %vm142_vm1, %v1500_v15  ;;  %1115 = vmatmul.msk.bf16.vlgmr.msra.gmra.mxu3 %vm142_vm1, %v1500_v15  ;;  %v1526_v52 = vld [vmem:[#allocation5 + $0xc4] sm:$0xf0]  ;;  %v1227_v54 = vor.u32 %v1527_v47, %v1224_v48  ;;  %v1509_v55 = vld [vmem:[#allocation5 + $0x44] sm:$0xf]  ;;  %v1152_v56 = vld [vmem:[#allocation5 + $0x48] sm:$0xf0]  ;;  %v1151_v57 = vor.u32 %v1510_v50, %v1150_v49 }
  0x23   :  { %463 = vmatpush.bf16.msrb.mxu2 %v1179_v29  ;;  %477 = vmatpush.bf16.msrb.mxu3 %v1243_v30  ;;  %v1215_v58 = vor.u32 %v1526_v52, %v1214_v51  ;;  %v1525_v59 = vld [vmem:[#allocation5 + $0xc4] sm:$0xf]  ;;  %v1216_v60 = vld [vmem:[#allocation5 + $0xc8] sm:$0xf0]  ;;  %v1142_v61 = vld [vmem:[#allocation5 + $0x30] sm:$0xf]  ;;  %v1155_v1 = vor.u32 %v1509_v55, %v1152_v56 }
  0x24   :  { %v1508_v62 = vld [vmem:[#allocation5 + $0x34] sm:$0xf0]  ;;  %v1206_v63 = vld [vmem:[#allocation5 + $0xb0] sm:$0xf]  ;;  %v1219_v2 = vor.u32 %v1525_v59, %v1216_v60  ;;  %v1507_v3 = vld [vmem:[#allocation5 + $0x34] sm:$0xf] }
  0x25   :  { %436 = vmatpush.bf16.msrb.mxu0 %v1167_v33  ;;  %450 = vmatpush.bf16.msrb.mxu1 %v1231_v34  ;;  %v1524_v0 = vld [vmem:[#allocation5 + $0xb4] sm:$0xf0]  ;;  %v1144_v4 = vld [vmem:[#allocation5 + $0x38] sm:$0xf0]  ;;  %v1523_v5 = vld [vmem:[#allocation5 + $0xb4] sm:$0xf]  ;;  %v1143_v6 = vor.u32 %v1508_v62, %v1142_v61 }
  0x26   :  { %v1207_v7 = vor.u32 %v1524_v0, %v1206_v63  ;;  %v1208_v8 = vld [vmem:[#allocation5 + $0xb8] sm:$0xf0]  ;;  %v1134_v9 = vld [vmem:[#allocation5 + $0x20] sm:$0xf]  ;;  %v1506_v10 = vld [vmem:[#allocation5 + $0x24] sm:$0xf0]  ;;  %v1147_v13 = vor.u32 %v1507_v3, %v1144_v4 }
  0x27   :  { %464 = vmatpush.bf16.msrb.mxu2 %v1171_v41  ;;  %478 = vmatpush.bf16.msrb.mxu3 %v1235_v42  ;;  %v1198_v11 = vld [vmem:[#allocation5 + $0xa0] sm:$0xf]  ;;  %v1522_v12 = vld [vmem:[#allocation5 + $0xa4] sm:$0xf0]  ;;  %v1211_v14 = vor.u32 %v1523_v5, %v1208_v8  ;;  %v1505_v15 = vld [vmem:[#allocation5 + $0x24] sm:$0xf]  ;;  %v1135_v17 = vor.u32 %v1506_v10, %v1134_v9 }
  0x28   :  { %v1136_v16 = vld [vmem:[#allocation5 + $0x28] sm:$0xf0]  ;;  %v1199_v18 = vor.u32 %v1522_v12, %v1198_v11  ;;  %v1521_v19 = vld [vmem:[#allocation5 + $0xa4] sm:$0xf]  ;;  %v1126_v21 = vld [vmem:[#allocation5 + $0x10] sm:$0xf] }
  0x29   :  { %437 = vmatpush.bf16.msrb.mxu0 %v1159_v45  ;;  %451 = vmatpush.bf16.msrb.mxu1 %v1223_v46  ;;  %v1200_v20 = vld [vmem:[#allocation5 + $0xa8] sm:$0xf0]  ;;  %v1504_v22 = vld [vmem:[#allocation5 + $0x14] sm:$0xf0]  ;;  %v1190_v23 = vld [vmem:[#allocation5 + $0x90] sm:$0xf]  ;;  %v1139_v25 = vor.u32 %v1505_v15, %v1136_v16 }
  0x2a   :  { %v1520_v24 = vld [vmem:[#allocation5 + $0x94] sm:$0xf0]  ;;  %v1203_v26 = vor.u32 %v1521_v19, %v1200_v20  ;;  %v1503_v27 = vld [vmem:[#allocation5 + $0x14] sm:$0xf]  ;;  %v1127_v28 = vor.u32 %v1504_v22, %v1126_v21  ;;  %v1128_v30 = vld [vmem:[#allocation5 + $0x18] sm:$0xf0] }
  0x2b   :  { %465 = vmatpush.bf16.msrb.mxu2 %v1163_v53  ;;  %479 = vmatpush.bf16.msrb.mxu3 %v1227_v54  ;;  %v1191_v29 = vor.u32 %v1520_v24, %v1190_v23  ;;  %v1519_v31 = vld [vmem:[#allocation5 + $0x94] sm:$0xf]  ;;  %v1192_v32 = vld [vmem:[#allocation5 + $0x98] sm:$0xf0]  ;;  %v1131_v33 = vor.u32 %v1503_v27, %v1128_v30  ;;  %v1118_v35 = vld [vmem:[#allocation5] sm:$0xf] }
  0x2c   :  { %v1195_v34 = vor.u32 %v1519_v31, %v1192_v32  ;;  %v1502_v36 = vld [vmem:[#allocation5 + $0x4] sm:$0xf0]  ;;  %v1182_v37 = vld [vmem:[#allocation5 + $0x80] sm:$0xf]  ;;  %v1501_v40 = vld [vmem:[#allocation5 + $0x4] sm:$0xf] }
  0x2d   :  { %438 = vmatpush.bf16.msrb.mxu0 %v1151_v57  ;;  %452 = vmatpush.bf16.msrb.mxu1 %v1215_v58  ;;  %v1119_v38 = vor.u32 %v1502_v36, %v1118_v35  ;;  %v1518_v39 = vld [vmem:[#allocation5 + $0x84] sm:$0xf0]  ;;  %v1120_v41 = vld [vmem:[#allocation5 + $0x8] sm:$0xf0]  ;;  %v1517_v44 = vld [vmem:[#allocation5 + $0x84] sm:$0xf] }
  0x2e   :  { %v1183_v42 = vor.u32 %v1518_v39, %v1182_v37  ;;  %v1123_v43 = vor.u32 %v1501_v40, %v1120_v41  ;;  %v1184_v45 = vld [vmem:[#allocation5 + $0x88] sm:$0xf0]  ;;  %v1302_v46 = vld [vmem:[#allocation7 + $0x70] sm:$0xf]  ;;  %v1548_v48 = vld [vmem:[#allocation7 + $0x74] sm:$0xf0] }
  0x2f   :  { %466 = vmatpush.bf16.msrb.mxu2 %v1155_v1  ;;  %480 = vmatpush.bf16.msrb.mxu3 %v1219_v2  ;;  %v1187_v47 = vor.u32 %v1517_v44, %v1184_v45  ;;  %v1366_v49 = vld [vmem:[#allocation7 + $0xf0] sm:$0xf]  ;;  %v1564_v50 = vld [vmem:[#allocation7 + $0xf4] sm:$0xf0]  ;;  %v1303_v51 = vor.u32 %v1548_v48, %v1302_v46  ;;  %v1547_v53 = vld [vmem:[#allocation7 + $0x74] sm:$0xf] }
  0x30   :  { %v1367_v52 = vor.u32 %v1564_v50, %v1366_v49  ;;  %v1304_v54 = vld [vmem:[#allocation7 + $0x78] sm:$0xf0]  ;;  %v1563_v55 = vld [vmem:[#allocation7 + $0xf4] sm:$0xf]  ;;  %v1294_v58 = vld [vmem:[#allocation7 + $0x60] sm:$0xf] }
  0x31   :  { %439 = vmatpush.bf16.msrb.mxu0 %v1143_v6  ;;  %453 = vmatpush.bf16.msrb.mxu1 %v1207_v7  ;;  %v1307_v56 = vor.u32 %v1547_v53, %v1304_v54  ;;  %v1368_v57 = vld [vmem:[#allocation7 + $0xf8] sm:$0xf0]  ;;  %v1546_v59 = vld [vmem:[#allocation7 + $0x64] sm:$0xf0]  ;;  %v1358_v62 = vld [vmem:[#allocation7 + $0xe0] sm:$0xf] }
  0x32   :  { %v1371_v60 = vor.u32 %v1563_v55, %v1368_v57  ;;  %v1295_v61 = vor.u32 %v1546_v59, %v1294_v58  ;;  %v1562_v63 = vld [vmem:[#allocation7 + $0xe4] sm:$0xf0]  ;;  %v1545_v0 = vld [vmem:[#allocation7 + $0x64] sm:$0xf]  ;;  %v1296_v2 = vld [vmem:[#allocation7 + $0x68] sm:$0xf0] }
  0x33   :  { %467 = vmatpush.bf16.msrb.mxu2 %v1147_v13  ;;  %481 = vmatpush.bf16.msrb.mxu3 %v1211_v14  ;;  %v1359_v1 = vor.u32 %v1562_v63, %v1358_v62  ;;  %v1561_v3 = vld [vmem:[#allocation7 + $0xe4] sm:$0xf]  ;;  %v1360_v4 = vld [vmem:[#allocation7 + $0xe8] sm:$0xf0]  ;;  %v1299_v5 = vor.u32 %v1545_v0, %v1296_v2  ;;  %v1286_v7 = vld [vmem:[#allocation7 + $0x50] sm:$0xf] }
  0x34   :  { %v1363_v6 = vor.u32 %v1561_v3, %v1360_v4  ;;  %v1544_v8 = vld [vmem:[#allocation7 + $0x54] sm:$0xf0]  ;;  %v1350_v9 = vld [vmem:[#allocation7 + $0xd0] sm:$0xf]  ;;  %v1543_v12 = vld [vmem:[#allocation7 + $0x54] sm:$0xf] }
  0x35   :  { %440 = vmatpush.bf16.msrb.mxu0 %v1135_v17  ;;  %454 = vmatpush.bf16.msrb.mxu1 %v1199_v18  ;;  %v1287_v10 = vor.u32 %v1544_v8, %v1286_v7  ;;  %v1560_v11 = vld [vmem:[#allocation7 + $0xd4] sm:$0xf0]  ;;  %v1288_v13 = vld [vmem:[#allocation7 + $0x58] sm:$0xf0]  ;;  %v1559_v16 = vld [vmem:[#allocation7 + $0xd4] sm:$0xf] }
  0x36   :  { %v1351_v14 = vor.u32 %v1560_v11, %v1350_v9  ;;  %v1291_v15 = vor.u32 %v1543_v12, %v1288_v13  ;;  %v1352_v17 = vld [vmem:[#allocation7 + $0xd8] sm:$0xf0]  ;;  %v1278_v19 = vld [vmem:[#allocation7 + $0x40] sm:$0xf]  ;;  %v1542_v20 = vld [vmem:[#allocation7 + $0x44] sm:$0xf0] }
  0x37   :  { %468 = vmatpush.bf16.msrb.mxu2 %v1139_v25  ;;  %482 = vmatpush.bf16.msrb.mxu3 %v1203_v26  ;;  %v1355_v18 = vor.u32 %v1559_v16, %v1352_v17  ;;  %v1342_v21 = vld [vmem:[#allocation7 + $0xc0] sm:$0xf]  ;;  %v1279_v22 = vor.u32 %v1542_v20, %v1278_v19  ;;  %v1558_v23 = vld [vmem:[#allocation7 + $0xc4] sm:$0xf0]  ;;  %v1541_v24 = vld [vmem:[#allocation7 + $0x44] sm:$0xf] }
  0x38   :  { %v1280_v25 = vld [vmem:[#allocation7 + $0x48] sm:$0xf0]  ;;  %v1343_v26 = vor.u32 %v1558_v23, %v1342_v21  ;;  %v1270_v31 = vld [vmem:[#allocation7 + $0x30] sm:$0xf]  ;;  %v1540_v32 = vld [vmem:[#allocation7 + $0x34] sm:$0xf0] }
  0x39   :  { %441 = vmatpush.bf16.msrb.mxu0 %v1127_v28  ;;  %455 = vmatpush.bf16.msrb.mxu1 %v1191_v29  ;;  %v1283_v27 = vor.u32 %v1541_v24, %v1280_v25  ;;  %v1557_v28 = vld [vmem:[#allocation7 + $0xc4] sm:$0xf]  ;;  %v1344_v29 = vld [vmem:[#allocation7 + $0xc8] sm:$0xf0]  ;;  %v1556_v35 = vld [vmem:[#allocation7 + $0xb4] sm:$0xf0] }
  0x3a   :  { %v1347_v30 = vor.u32 %v1557_v28, %v1344_v29  ;;  %v1539_v36 = vld [vmem:[#allocation7 + $0x34] sm:$0xf]  ;;  %v1272_v37 = vld [vmem:[#allocation7 + $0x38] sm:$0xf0]  ;;  %v1538_v44 = vld [vmem:[#allocation7 + $0x24] sm:$0xf0] }
  0x3b   :  { %469 = vmatpush.bf16.msrb.mxu2 %v1131_v33  ;;  %483 = vmatpush.bf16.msrb.mxu3 %v1195_v34  ;;  %v1334_v33 = vld [vmem:[#allocation7 + $0xb0] sm:$0xf]  ;;  %v1271_v34 = vor.u32 %v1540_v32, %v1270_v31  ;;  %v1275_v39 = vor.u32 %v1539_v36, %v1272_v37  ;;  %v1555_v40 = vld [vmem:[#allocation7 + $0xb4] sm:$0xf]  ;;  %v1336_v41 = vld [vmem:[#allocation7 + $0xb8] sm:$0xf0] }
  0x3c   :  { %v1326_v45 = vld [vmem:[#allocation7 + $0xa0] sm:$0xf]  ;;  %v1537_v48 = vld [vmem:[#allocation7 + $0x24] sm:$0xf]  ;;  %v1264_v49 = vld [vmem:[#allocation7 + $0x28] sm:$0xf0] }
  0x3d   :  { %442 = vmatpush.bf16.msrb.mxu0 %v1119_v38  ;;  %456 = vmatpush.bf16.msrb.mxu1 %v1183_v42  ;;  %v1335_v38 = vor.u32 %v1556_v35, %v1334_v33  ;;  %v1339_v42 = vor.u32 %v1555_v40, %v1336_v41  ;;  %v1328_v53 = vld [vmem:[#allocation7 + $0xa8] sm:$0xf0]  ;;  %v1254_v54 = vld [vmem:[#allocation7 + $0x10] sm:$0xf]  ;;  %v1552_v58 = vld [vmem:[#allocation7 + $0x94] sm:$0xf0] }
  0x3e   :  { %v1318_v57 = vld [vmem:[#allocation7 + $0x90] sm:$0xf]  ;;  %v1535_v62 = vld [vmem:[#allocation7 + $0x14] sm:$0xf]  ;;  %v1256_v63 = vld [vmem:[#allocation7 + $0x18] sm:$0xf0] }
  0x3f   :  { %470 = vmatpush.bf16.msrb.mxu2 %v1123_v43  ;;  %484 = vmatpush.bf16.msrb.mxu3 %v1187_v47  ;;  %v1262_v43 = vld [vmem:[#allocation7 + $0x20] sm:$0xf]  ;;  %v1554_v47 = vld [vmem:[#allocation7 + $0xa4] sm:$0xf0]  ;;  %v1860_v59 = vld [vmem:[%s1883_s2] sm:$0xf] }
  0x40   :  { %v1263_v46 = vor.u32 %v1538_v44, %v1262_v43  ;;  %v1327_v50 = vor.u32 %v1554_v47, %v1326_v45  ;;  %v1551_v0 = vld [vmem:[#allocation7 + $0x94] sm:$0xf]  ;;  %v1320_v2 = vld [vmem:[#allocation7 + $0x98] sm:$0xf0]  ;;  %v1246_v3 = vld [vmem:[#allocation7] sm:$0xf] }
  0x41   :  { %699 = vmatpush.bf16.msra.mxu0 %v1303_v51  ;;  %713 = vmatpush.bf16.msra.mxu1 %v1367_v52  ;;  %v1267_v51 = vor.u32 %v1537_v48, %v1264_v49  ;;  %v1553_v52 = vld [vmem:[#allocation7 + $0xa4] sm:$0xf]  ;;  %v1534_v4 = vld [vmem:[#allocation7 + $0x4] sm:$0xf0]  ;;  %v1248_v9 = vld [vmem:[#allocation7 + $0x8] sm:$0xf0] }
  0x42   :  { %v1331_v55 = vor.u32 %v1553_v52, %v1328_v53  ;;  %v1550_v7 = vld [vmem:[#allocation7 + $0x84] sm:$0xf0]  ;;  %v1533_v8 = vld [vmem:[#allocation7 + $0x4] sm:$0xf]  ;;  %v1312_v11 = vld [vmem:[#allocation7 + $0x88] sm:$0xf0]  ;;  %v1247_v12 = vor.u32 %v1534_v4, %v1246_v3 }
  0x43   :  { %727 = vmatpush.bf16.msra.mxu2 %v1307_v56  ;;  %741 = vmatpush.bf16.msra.mxu3 %v1371_v60  ;;  %v1536_v56 = vld [vmem:[#allocation7 + $0x14] sm:$0xf0]  ;;  %v1251_v16 = vor.u32 %v1533_v8, %v1248_v9  ;;  %v121_v33 = vperm.slane %v1860_v59, 2  ;;  %s1091_s25 = sshll.u32 %s1769_s3, 4  ;;  %s1093_s28 = sshll.u32 %s1891_s10, 4  ;;  %s1092_s25 = int_to_ptr.vmem [resolvable:$true] %s1091_s25  ;;  %s1094_s28 = int_to_ptr.hbm [resolvable:$true] %s1093_s28 }
  0x44   :  { %v1255_v60 = vor.u32 %v1536_v56, %v1254_v54  ;;  %v1572_v48 = vld [vmem:[#allocation8 + $0x38] sm:$0xff]  ;;  %v1571_v54 = vld [vmem:[#allocation8 + $0x30] sm:$0xff] }
  0x45   :  { %700 = vmatpush.bf16.msra.mxu0 %v1295_v61  ;;  %714 = vmatpush.bf16.msra.mxu1 %v1359_v1  ;;  %v1319_v61 = vor.u32 %v1552_v58, %v1318_v57  ;;  %v1259_v1 = vor.u32 %v1535_v62, %v1256_v63  ;;  %v1580_v49 = vld [vmem:[#allocation8 + $0x78] sm:$0xff]  ;;  %v1570_v58 = vld [vmem:[#allocation8 + $0x28] sm:$0xff]  ;;  %v1569_v63 = vld [vmem:[#allocation8 + $0x20] sm:$0xff] }
  0x46   :  { %v1588_v3 = vld [vmem:[#allocation10 + $0x38] sm:$0xff] }
  0x47   :  { %728 = vmatpush.bf16.msra.mxu2 %v1299_v5  ;;  %742 = vmatpush.bf16.msra.mxu3 %v1363_v6  ;;  %v1323_v5 = vor.u32 %v1551_v0, %v1320_v2  ;;  %v1310_v6 = vld [vmem:[#allocation7 + $0x80] sm:$0xf]  ;;  %v1578_v2 = vld [vmem:[#allocation8 + $0x68] sm:$0xff]  ;;  %v1568_v4 = vld [vmem:[#allocation8 + $0x18] sm:$0xff] }
  0x48   :  { %v1311_v13 = vor.u32 %v1550_v7, %v1310_v6  ;;  %v1587_v6 = vld [vmem:[#allocation10 + $0x30] sm:$0xff]  ;;  %v1596_v8 = vld [vmem:[#allocation10 + $0x78] sm:$0xff] }
  0x49   :  { %701 = vmatpush.bf16.msra.mxu0 %v1287_v10  ;;  %715 = vmatpush.bf16.msra.mxu1 %v1351_v14  ;;  %v1549_v10 = vld [vmem:[#allocation7 + $0x84] sm:$0xf]  ;;  %v119_v14 = vperm.slane %v1860_v59, 0  ;;  %v1567_v7 = vld [vmem:[#allocation8 + $0x10] sm:$0xff]  ;;  %v1576_v9 = vld [vmem:[#allocation8 + $0x58] sm:$0xff] }
  0x4a   :  { %v1315_v19 = vor.u32 %v1549_v10, %v1312_v11  ;;  %v1586_v10 = vld [vmem:[#allocation10 + $0x28] sm:$0xff] }
  0x4b   :  { %729 = vmatpush.bf16.msra.mxu2 %v1291_v15  ;;  %743 = vmatpush.bf16.msra.mxu3 %v1355_v18  ;;  %v120_v15 = vperm.slane %v1860_v59, 1  ;;  %v1566_v11 = vld [vmem:[#allocation8 + $0x8] sm:$0xff] }
  0x4d   :  { %702 = vmatpush.bf16.msra.mxu0 %v1279_v22  ;;  %716 = vmatpush.bf16.msra.mxu1 %v1343_v26 }
  0x4f   :  { %730 = vmatpush.bf16.msra.mxu2 %v1283_v27  ;;  %744 = vmatpush.bf16.msra.mxu3 %v1347_v30 }
  0x51   :  { %703 = vmatpush.bf16.msra.mxu0 %v1271_v34  ;;  %717 = vmatpush.bf16.msra.mxu1 %v1335_v38  ;;  %v122_v34 = vperm.slane %v1860_v59, 3 }
  0x53   :  { %731 = vmatpush.bf16.msra.mxu2 %v1275_v39  ;;  %745 = vmatpush.bf16.msra.mxu3 %v1339_v42 }
  0x55   :  { %704 = vmatpush.bf16.msra.mxu0 %v1263_v46  ;;  %718 = vmatpush.bf16.msra.mxu1 %v1327_v50 }
  0x57   :  { %732 = vmatpush.bf16.msra.mxu2 %v1267_v51  ;;  %746 = vmatpush.bf16.msra.mxu3 %v1331_v55  ;;  %v1579_v55 = vld [vmem:[#allocation8 + $0x70] sm:$0xff] }
  0x59   :  { %705 = vmatpush.bf16.msra.mxu0 %v1255_v60  ;;  %719 = vmatpush.bf16.msra.mxu1 %v1319_v61 }
  0x5b   :  { %733 = vmatpush.bf16.msra.mxu2 %v1259_v1  ;;  %747 = vmatpush.bf16.msra.mxu3 %v1323_v5  ;;  %v1577_v5 = vld [vmem:[#allocation8 + $0x60] sm:$0xff] }
  0x5d   :  { %706 = vmatpush.bf16.msra.mxu0 %v1247_v12  ;;  %720 = vmatpush.bf16.msra.mxu1 %v1311_v13  ;;  %v1595_v12 = vld [vmem:[#allocation10 + $0x70] sm:$0xff] }
  0x5e   :  { %v1575_v13 = vld [vmem:[#allocation8 + $0x50] sm:$0xff] }
  0x5f   :  { %734 = vmatpush.bf16.msra.mxu2 %v1251_v16  ;;  %748 = vmatpush.bf16.msra.mxu3 %v1315_v19  ;;  %v1594_v16 = vld [vmem:[#allocation10 + $0x68] sm:$0xff]  ;;  %v1593_v19 = vld [vmem:[#allocation10 + $0x60] sm:$0xff] }
  0x9d   :  { %v168_v17 = vpop.f32.mrf.mxu0  ;;  %v182_v18 = vpop.f32.mrf.mxu1 }
  0x9e   :  { %v169_v20 = vadd.f32 %v168_v17, %v119_v14  ;;  %v183_v21 = vadd.f32 %v182_v18, %v120_v15  ;;  %v1574_v17 = vld [vmem:[#allocation8 + $0x48] sm:$0xff]  ;;  %v1584_v18 = vld [vmem:[#allocation10 + $0x18] sm:$0xff] }
  0xa0   :  { %v215_v22 = vmax.f32 %v169_v20, 0.0  ;;  %v216_v23 = vmax.f32 %v183_v21, 0.0  ;;  %v1573_v20 = vld [vmem:[#allocation8 + $0x40] sm:$0xff]  ;;  %v1583_v21 = vld [vmem:[#allocation10 + $0x10] sm:$0xff] }
  0xa2   :  { %v223_v30 = vpack.c.bf16 %v216_v23, %v215_v22  ;;  %v1592_v22 = vld [vmem:[#allocation10 + $0x58] sm:$0xff]  ;;  %v1582_v23 = vld [vmem:[#allocation10 + $0x8] sm:$0xff] }
  0xa4   :  { %v267_v36 = vunpack.c.l.b16 %v223_v30  ;;  %v268_v37 = vunpack.c.h.b16 %v223_v30 }
  0xa5   :  { %v196_v24 = vpop.f32.mrf.mxu2  ;;  %v210_v25 = vpop.f32.mrf.mxu3 }
  0xa6   :  { %v170_v26 = vpop.f32.mrf.mxu0  ;;  %v184_v27 = vpop.f32.mrf.mxu1  ;;  %v197_v42 = vadd.f32 %v196_v24, %v121_v33  ;;  %v211_v43 = vadd.f32 %v210_v25, %v122_v34  ;;  %v1591_v24 = vld [vmem:[#allocation10 + $0x50] sm:$0xff]  ;;  %v1581_v25 = vld [vmem:[#allocation10] sm:$0xff] }
  0xa7   :  { %v171_v28 = vadd.f32 %v170_v26, %v119_v14  ;;  %v185_v29 = vadd.f32 %v184_v27, %v120_v15  ;;  %v1585_v14 = vld [vmem:[#allocation10 + $0x20] sm:$0xff]  ;;  %v259_v26 = vld [vmem:[%s1885_s4] sm:$0x3]  ;;  %v1590_v27 = vld [vmem:[#allocation10 + $0x48] sm:$0xff] }
  0xa8   :  { %v217_v50 = vmax.f32 %v197_v42, 0.0  ;;  %v218_v51 = vmax.f32 %v211_v43, 0.0  ;;  %v1565_v15 = vld [vmem:[#allocation8] sm:$0xff]  ;;  %v261_v30 = vperm.slane %v259_v26, 0 }
  0xa9   :  { %v219_v31 = vmax.f32 %v171_v28, 0.0  ;;  %v220_v32 = vmax.f32 %v185_v29, 0.0 }
  0xaa   :  { %v224_v56 = vpack.c.bf16 %v218_v51, %v217_v50 }
  0xab   :  { %v225_v35 = vpack.c.bf16 %v220_v32, %v219_v31  ;;  %v1589_v31 = vld [vmem:[#allocation10 + $0x40] sm:$0xff] }
  0xac   :  { %v531_v59 = vunpack.c.l.b16 %v224_v56  ;;  %v532_v60 = vunpack.c.h.b16 %v224_v56 }
  0xad   :  { %v269_v38 = vunpack.c.l.b16 %v225_v35  ;;  %v270_v39 = vunpack.c.h.b16 %v225_v35  ;;  %v198_v40 = vpop.f32.mrf.mxu2  ;;  %v212_v41 = vpop.f32.mrf.mxu3  ;;  %v262_v35 = vperm.slane %v259_v26, 1 }
  0xae   :  { %v199_v44 = vadd.f32 %v198_v40, %v121_v33  ;;  %v213_v45 = vadd.f32 %v212_v41, %v122_v34 }
  0xaf   :  { %v271_v46 = vpack.c.b16 %v269_v38, %v267_v36  ;;  %v272_v47 = vpack.c.b16 %v270_v39, %v268_v37 }
  0xb0   :  { %v221_v52 = vmax.f32 %v199_v44, 0.0  ;;  %v222_v53 = vmax.f32 %v213_v45, 0.0  ;;  %v523_v44 = vld [vmem:[%s1887_s6] sm:$0x3] }
  0xb1   :  { %443 = vmatmul.bf16.vlgmr.msrb.gmra.mxu0 %v271_v46  ;;  %457 = vmatmul.bf16.vlgmr.msrb.gmra.mxu1 %v272_v47 }
  0xb2   :  { %471 = vmatmul.bf16.vlgmr.msrb.gmra.mxu2 %v271_v46  ;;  %485 = vmatmul.bf16.vlgmr.msrb.gmra.mxu3 %v272_v47  ;;  %v226_v57 = vpack.c.bf16 %v222_v53, %v221_v52  ;;  %v525_v52 = vperm.slane %v523_v44, 0 }
  0xb3   :  { %1051 = vmatpush.bf16.msrb.mxu2 %v1572_v48  ;;  %1065 = vmatpush.bf16.msrb.mxu3 %v1580_v49 }
  0xb4   :  { %v533_v61 = vunpack.c.l.b16 %v226_v57  ;;  %v534_v62 = vunpack.c.h.b16 %v226_v57  ;;  %927 = vmatpush.bf16.msrb.mxu0 %v1588_v3  ;;  %941 = vmatpush.bf16.msrb.mxu1 %v1596_v8 }
  0xb6   :  { %v535_v0 = vpack.c.b16 %v533_v61, %v531_v59  ;;  %v536_v1 = vpack.c.b16 %v534_v62, %v532_v60  ;;  %v526_v60 = vperm.slane %v523_v44, 1 }
  0xb7   :  { %1052 = vmatpush.bf16.msrb.mxu2 %v1571_v54  ;;  %1066 = vmatpush.bf16.msrb.mxu3 %v1579_v55 }
  0xb8   :  { %928 = vmatpush.bf16.msrb.mxu0 %v1587_v6  ;;  %942 = vmatpush.bf16.msrb.mxu1 %v1595_v12 }
  0xbb   :  { %1053 = vmatpush.bf16.msrb.mxu2 %v1570_v58  ;;  %1067 = vmatpush.bf16.msrb.mxu3 %v1578_v2 }
  0xbc   :  { %929 = vmatpush.bf16.msrb.mxu0 %v1586_v10  ;;  %943 = vmatpush.bf16.msrb.mxu1 %v1594_v16 }
  0xbf   :  { %1054 = vmatpush.bf16.msrb.mxu2 %v1569_v63  ;;  %1068 = vmatpush.bf16.msrb.mxu3 %v1577_v5 }
  0xc0   :  { %930 = vmatpush.bf16.msrb.mxu0 %v1585_v14  ;;  %944 = vmatpush.bf16.msrb.mxu1 %v1593_v19 }
  0xc1   :  { %707 = vmatmul.bf16.vlgmr.msra.gmra.mxu0 %v535_v0  ;;  %721 = vmatmul.bf16.vlgmr.msra.gmra.mxu1 %v536_v1 }
  0xc2   :  { %735 = vmatmul.bf16.vlgmr.msra.gmra.mxu2 %v535_v0  ;;  %749 = vmatmul.bf16.vlgmr.msra.gmra.mxu3 %v536_v1 }
  0xc3   :  { %1055 = vmatpush.bf16.msrb.mxu2 %v1568_v4  ;;  %1069 = vmatpush.bf16.msrb.mxu3 %v1576_v9 }
  0xc4   :  { %931 = vmatpush.bf16.msrb.mxu0 %v1584_v18  ;;  %945 = vmatpush.bf16.msrb.mxu1 %v1592_v22 }
  0xc7   :  { %1056 = vmatpush.bf16.msrb.mxu2 %v1567_v7  ;;  %1070 = vmatpush.bf16.msrb.mxu3 %v1575_v13 }
  0xc8   :  { %932 = vmatpush.bf16.msrb.mxu0 %v1583_v21  ;;  %946 = vmatpush.bf16.msrb.mxu1 %v1591_v24 }
  0xcb   :  { %1057 = vmatpush.bf16.msrb.mxu2 %v1566_v11  ;;  %1071 = vmatpush.bf16.msrb.mxu3 %v1574_v17 }
  0xcc   :  { %933 = vmatpush.bf16.msrb.mxu0 %v1582_v23  ;;  %947 = vmatpush.bf16.msrb.mxu1 %v1590_v27 }
  0xcf   :  { %1058 = vmatpush.bf16.msrb.mxu2 %v1565_v15  ;;  %1072 = vmatpush.bf16.msrb.mxu3 %v1573_v20  ;;  %v1607_v20 = vld [vmem:[%s1890_s9] ss:$0 sm:$0xff] }
  0xd0   :  { %934 = vmatpush.bf16.msrb.mxu0 %v1581_v25  ;;  %948 = vmatpush.bf16.msrb.mxu1 %v1589_v31 }
 0x12e   :  { %v444_v28 = vpop.f32.mrf.mxu0  ;;  %v458_v29 = vpop.f32.mrf.mxu1 }
 0x12f   :  { %v445_v32 = vadd.f32 %v444_v28, %v261_v30 }
 0x131   :  { %v459_v38 = vadd.f32 %v458_v29, %v445_v32 }
 0x133   :  { %v755_v42 = vmax.f32 %v459_v38, 0.0 }
 0x135   :  { %v472_v33 = vpop.f32.mrf.mxu2  ;;  %v486_v34 = vpop.f32.mrf.mxu3 }
 0x136   :  { %v446_v36 = vpop.f32.mrf.mxu0  ;;  %v460_v37 = vpop.f32.mrf.mxu1  ;;  %v473_v41 = vadd.f32 %v472_v33, %v262_v35 }
 0x137   :  { %v447_v39 = vadd.f32 %v446_v36, %v261_v30 }
 0x138   :  { %v487_v48 = vadd.f32 %v486_v34, %v473_v41 }
 0x139   :  { %v461_v40 = vadd.f32 %v460_v37, %v447_v39 }
 0x13a   :  { %v756_v54 = vmax.f32 %v487_v48, 0.0 }
 0x13b   :  { %v757_v43 = vmax.f32 %v461_v40, 0.0 }
 0x13d   :  { %v759_v45 = vpack.c.bf16 %v757_v43, %v755_v42  ;;  %v474_v46 = vpop.f32.mrf.mxu2  ;;  %v488_v47 = vpop.f32.mrf.mxu3 }
 0x13e   :  { %v475_v49 = vadd.f32 %v474_v46, %v262_v35  ;;  %v708_v50 = vpop.f32.mrf.mxu0  ;;  %v722_v51 = vpop.f32.mrf.mxu1 }
 0x13f   :  { %1059 = vmatmul.bf16.vlgmr.msrb.gmra.mxu2 %v759_v45  ;;  %v709_v56 = vadd.f32 %v708_v50, %v525_v52 }
 0x140   :  { %v489_v53 = vadd.f32 %v488_v47, %v475_v49 }
 0x141   :  { %v723_v62 = vadd.f32 %v722_v51, %v709_v56 }
 0x142   :  { %v758_v55 = vmax.f32 %v489_v53, 0.0 }
 0x143   :  { %v761_v3 = vmax.f32 %v723_v62, 0.0 }
 0x144   :  { %v760_v57 = vpack.c.bf16 %v758_v55, %v756_v54 }
 0x145   :  { %v736_v58 = vpop.f32.mrf.mxu2  ;;  %v750_v59 = vpop.f32.mrf.mxu3 }
 0x146   :  { %1073 = vmatmul.bf16.vlgmr.msrb.gmra.mxu3 %v760_v57  ;;  %v710_v61 = vpop.f32.mrf.mxu0  ;;  %v724_v0 = vpop.f32.mrf.mxu1  ;;  %v737_v2 = vadd.f32 %v736_v58, %v526_v60 }
 0x147   :  { %v711_v63 = vadd.f32 %v710_v61, %v525_v52 }
 0x148   :  { %v751_v7 = vadd.f32 %v750_v59, %v737_v2 }
 0x149   :  { %v725_v1 = vadd.f32 %v724_v0, %v711_v63 }
 0x14a   :  { %v762_v11 = vmax.f32 %v751_v7, 0.0 }
 0x14b   :  { %v763_v4 = vmax.f32 %v725_v1, 0.0 }
 0x14d   :  { %v765_v5 = vpack.c.bf16 %v763_v4, %v761_v3  ;;  %v738_v6 = vpop.f32.mrf.mxu2  ;;  %v752_v9 = vpop.f32.mrf.mxu3 }
 0x14e   :  { %v739_v8 = vadd.f32 %v738_v6, %v526_v60 }
 0x14f   :  { %935 = vmatmul.bf16.vlgmr.msrb.gmra.mxu0 %v765_v5 }
 0x150   :  { %v753_v10 = vadd.f32 %v752_v9, %v739_v8 }
 0x152   :  { %v764_v12 = vmax.f32 %v753_v10, 0.0 }
 0x154   :  { %v766_v13 = vpack.c.bf16 %v764_v12, %v762_v11 }
 0x156   :  { %949 = vmatmul.bf16.vlgmr.msrb.gmra.mxu1 %v766_v13 }
 0x1c2   :  { %v1060_v15 = vpop.f32.mrf.mxu2 }
 0x1c9   :  { %v1074_v18 = vpop.f32.mrf.mxu3 }
 0x1ca   :  { %v1062_v26 = vpop.f32.mrf.mxu2 }
 0x1cc   :  { %v936_v14 = vpop.f32.mrf.mxu0 }
 0x1d1   :  { %v1076_v28 = vpop.f32.mrf.mxu3 }
 0x1d3   :  { %v950_v16 = vpop.f32.mrf.mxu1 }
 0x1d4   :  { %v951_v17 = vadd.f32 %v950_v16, %v936_v14  ;;  %v938_v23 = vpop.f32.mrf.mxu0 }
 0x1d6   :  { %v1061_v19 = vadd.f32 %v1060_v15, %v951_v17 }
 0x1d8   :  { %v1075_v21 = vadd.f32 %v1074_v18, %v1061_v19 }
 0x1da   :  { %v1083_v22 = vadd.f32 %v1607_v20, %v1075_v21 }
 0x1db   :  { %v952_v24 = vpop.f32.mrf.mxu1 }
 0x1dc   :  { %1085 = vst [vmem:[#allocation11] sm:$0xff] %v1083_v22  ;;  %v953_v25 = vadd.f32 %v952_v24, %v938_v23 }
 0x1de   :  { %v1063_v27 = vadd.f32 %v1062_v26, %v953_v25 }
 0x1e0   :  { %v1077_v29 = vadd.f32 %v1076_v28, %v1063_v27 }
 0x1e2   :  { %v1084_v30 = vadd.f32 %v1607_v20, %v1077_v29 }
 0x1e4   :  { %1086 = vst [vmem:[#allocation11 + $0x8] sm:$0xff] %v1084_v30 }
 0x1e5   :  { %1099 = dma.vmem_to_hbm [thread:$0]  %s1092_s25, 256, %s1094_s28, [#allocation4], %s1761_s21, %s1761_s21, %s1762_s22  }
 0x1e6   :  { %1758 = dma.done.wait [#allocation4], 256  }
 0x1e7   :  { %1759 = vsyncadd [#allocation4], 4294967040 }
 0x1e8   :  { %1104 = vsyncpa [#allocation3], 1 }
 0x1e9   :  { %1105 = vsyncpa [#allocation6], 1 }
 0x1ea   :  { %1106 = vsyncpa [#allocation9], 1 }
 0x1eb   :  { %1107 = vsyncpa [#allocation4], 1 }

</bundles_post_ra>
